<compile_context>
chip_gen: v6e
topology: v6e:2x2x1
jax: 0.10.0
libtpu: 0.0.40
codegen_flags: <defaults>
</compile_context>

<pallas_src>
import functools

import jax
import jax.numpy as jnp
from jax import lax
from jax.experimental import pallas as pl
from jax.experimental.pallas import tpu as pltpu

_SUB = 8
_LANE = 128
_CHUNK = _SUB * _LANE          # samples per (8,128) slab
_TB = 512                      # max slabs per grid step (sweep 256-512)
_UNROLL = 8                    # slabs per fori_loop iteration


def _focal_kernel(preds_ref, labels_ref, out_ref, *, alpha, gamma,
                  num_classes, tb, unroll):
    """One grid step: tb (8,128) sample-slabs, all classes resident per slab."""
    C = num_classes

    # Hoisted (8,128) constants -- computed once, reused by every slab.
    # (JAX does not CSE broadcast_in_dim: do NOT move these into the loop.)
    zero = jnp.zeros((_SUB, _LANE), jnp.float32)
    alpha_splat = tuple(jnp.full((_SUB, _LANE), a, jnp.float32) for a in alpha)

    g = float(gamma)
    gi = int(g)
    int_gamma = (g == gi) and 0 <= gi <= 16

    def slab(s, acc):
        # Lazy per-slab loads: C class vregs + 1 label vreg live at a time.
        lab = labels_ref[s].astype(jnp.int32)                     # (8,128)
        xs = [preds_ref[c, s].astype(jnp.float32) for c in range(C)]

        # max over classes (pure VPU, class slabs stay in vregs).
        mx = xs[0]
        for c in range(1, C):
            mx = jnp.maximum(mx, xs[c])

        # Single class pass: softmax denominator + one-hot gather of (x - max)
        # and alpha at the label class (one shared compare per class).
        ssum = None
        z_sel = zero
        a_sel = zero
        for c in range(C):
            zc = xs[c] - mx
            ec = jnp.exp(zc)                                      # EUP
            ssum = ec if ssum is None else ssum + ec
            hit = lab == c
            z_sel = jnp.where(hit, zc, z_sel)
            a_sel = jnp.where(hit, alpha_splat[c], a_sel)

        logp = z_sel - jnp.log(ssum)          # log_softmax at the label class
        p = jnp.exp(logp)
        q = 1.0 - p
        if int_gamma:                         # integer gamma: VPU multiplies
            focal = q if gi else jnp.ones_like(q)
            for _ in range(gi - 1):
                focal = focal * q
        else:                                 # non-integer gamma: pow on EUP
            focal = jnp.power(jnp.maximum(q, 0.0), g)   # clamp avoids NaN

        # Padded / out-of-range labels hit no class -> a_sel == 0 -> exactly 0
        # contribution; no explicit mask needed.
        return acc + a_sel * focal * logp

    # Walk the slab axis: fori_loop with partial unroll + static tail.
    n_main, rem = divmod(tb, unroll)
    acc = zero
    if n_main > 0:
        def body(i, a):
            base = i * unroll
            for u in range(unroll):
                a = slab(base + u, a)
            return a
        acc = lax.fori_loop(0, n_main, body, acc)
    for u in range(rem):
        acc = slab(n_main * unroll + u, acc)

    out_ref[0] = -acc                          # lane-dense (8,128) partial sum


def focal_loss(preds, labels, alpha=(0.8, 0.4, 0.8), gamma=2.0,
               size_average=True):
    """Pallas focal loss. preds: [..., C] float logits, labels: [...] int.

    Input contract: real labels must lie in [0, num_classes). Out-of-range
    labels contribute 0 (the PyTorch gather would clamp instead).
    """
    num_classes = preds.shape[-1]

    # Reproduce the module's alpha construction (list vs scalar).
    if isinstance(alpha, (list, tuple)):
        assert len(alpha) == num_classes
        alpha_vec = tuple(float(a) for a in alpha)
    else:
        assert float(alpha) < 1
        a0 = float(alpha)
        alpha_vec = (a0,) + (1.0 - a0,) * (num_classes - 1)

    preds2 = preds.reshape(-1, num_classes)           # (M, C), keep input dtype
    labels2 = labels.reshape(-1)
    m = preds2.shape[0]

    # ---- tiling: 1024-sample slabs, tb slabs per grid step ------------------
    chunks = pl.cdiv(m, _CHUNK)
    if chunks <= _TB:
        # Split across both v7x TensorCores when there is enough work.
        n_tiles = 2 if chunks >= 2 * _UNROLL else 1
    else:
        n_tiles = pl.cdiv(chunks, _TB)
        if n_tiles % 2:                                # keep megacore balanced
            n_tiles += 1
    tb = pl.cdiv(chunks, n_tiles)
    n_tiles = pl.cdiv(chunks, tb)
    chunks_padded = n_tiles * tb
    m_padded = chunks_padded * _CHUNK

    # int8 labels: 4x fewer label bytes over HBM (v5e/v6e are HBM-bound);
    # widened to int32 in-kernel.
    label_dtype = jnp.int8 if num_classes <= 126 else jnp.int32

    pad = m_padded - m
    if pad:
        preds2 = jnp.pad(preds2, ((0, pad), (0, 0)))
        labels2 = jnp.pad(labels2, (0, pad),
                          constant_values=num_classes)  # hits no class -> 0
    labels2 = labels2.astype(label_dtype)

    # Class-major, lane-dense relayout.
    # TODO(synk): accept class-major logits [C, ...] from upstream to remove
    # this transpose -- it is one extra full HBM read+write of preds.
    preds_cm = preds2.T.reshape(num_classes, chunks_padded, _SUB, _LANE)
    labels_r = labels2.reshape(chunks_padded, _SUB, _LANE)

    kernel = functools.partial(
        _focal_kernel, alpha=alpha_vec, gamma=float(gamma),
        num_classes=num_classes, tb=tb, unroll=_UNROLL)

    # TODO(synk): add class-axis tiling (online softmax over an 'arbitrary'
    # grid axis) if num_classes grows beyond ~32; today the whole class axis
    # is one block and the per-class loops fully unroll (fine for C=3).
    partials = pl.pallas_call(
        kernel,
        out_shape=jax.ShapeDtypeStruct((n_tiles, _SUB, _LANE), jnp.float32),
        grid=(n_tiles,),
        in_specs=[
            pl.BlockSpec((num_classes, tb, _SUB, _LANE),
                         lambda i: (0, i, 0, 0)),
            pl.BlockSpec((tb, _SUB, _LANE), lambda i: (i, 0, 0)),
        ],
        out_specs=pl.BlockSpec((1, _SUB, _LANE), lambda i: (i, 0, 0)),
        compiler_params=pltpu.CompilerParams(
            dimension_semantics=("parallel",),
            vmem_limit_bytes=32 * 1024 * 1024),
    )(preds_cm, labels_r)

    total = jnp.sum(partials)
    if size_average:
        return total / jnp.float32(m)
    return total


def _focal_loss_ref(preds, labels, alpha, gamma=2.0, size_average=True):
    """Pure-JAX reference mirroring the PyTorch module."""
    num_classes = preds.shape[-1]
    preds2 = preds.reshape(-1, num_classes).astype(jnp.float32)
    labels2 = labels.reshape(-1).astype(jnp.int32)
    logsoft = jax.nn.log_softmax(preds2, axis=1)
    logp = jnp.take_along_axis(logsoft, labels2[:, None], axis=1)[:, 0]
    p = jnp.exp(logp)
    a = jnp.asarray(alpha, jnp.float32)[labels2]
    loss = -a * jnp.power(1.0 - p, gamma) * logp
    return jnp.mean(loss) if size_average else jnp.sum(loss)


if __name__ == "__main__":
    # Module defaults: alpha=[0.8, 0.4, 0.8], gamma=2, num_classes=3.
    alpha = [0.8, 0.4, 0.8]
    gamma = 2.0
    num_classes = 3

    key = jax.random.PRNGKey(0)

    # --- small test (module-like shapes B=2, N=8) ----------------------------
    kp, kl, key = jax.random.split(key, 3)
    preds = jax.random.normal(kp, (2, 8, num_classes), dtype=jnp.float32)
    labels = jax.random.randint(kl, (2, 8), 0, num_classes, dtype=jnp.int32)

    out_mean = jax.block_until_ready(
        focal_loss(preds, labels, alpha, gamma=gamma, size_average=True))
    ref_mean = _focal_loss_ref(preds, labels, alpha, gamma=gamma,
                               size_average=True)
    assert jnp.allclose(out_mean, ref_mean, rtol=1e-5, atol=1e-6), (out_mean,
                                                                    ref_mean)

    out_sum = jax.block_until_ready(
        focal_loss(preds, labels, alpha, gamma=gamma, size_average=False))
    ref_sum = _focal_loss_ref(preds, labels, alpha, gamma=gamma,
                              size_average=False)
    assert jnp.allclose(out_sum, ref_sum, rtol=1e-5, atol=1e-6), (out_sum,
                                                                  ref_sum)

    # --- larger test: exercises the multi-tile grid, the in-kernel fori_loop
    #     (unrolled-by-8 + static tail) and the ragged-tail padding paths -----
    kp, kl, key = jax.random.split(key, 3)
    preds_b = jax.random.normal(kp, (2, 20400, num_classes), dtype=jnp.float32)
    labels_b = jax.random.randint(kl, (2, 20400), 0, num_classes,
                                  dtype=jnp.int32)
    out_b = jax.block_until_ready(
        focal_loss(preds_b, labels_b, alpha, gamma=gamma, size_average=True))
    ref_b = _focal_loss_ref(preds_b, labels_b, alpha, gamma=gamma,
                            size_average=True)
    assert jnp.allclose(out_b, ref_b, rtol=1e-4, atol=1e-6), (out_b, ref_b)

    print("KERNEL_OK")
</pallas_src>

<mosaic_0001>
module attributes {stable_mosaic.version = 11 : i64} {
  func.func @_focal_kernel(%arg0: i32, %arg1: memref<3x1x8x128xf32, #tpu.memory_space<vmem>>, %arg2: memref<1x8x128xi8, #tpu.memory_space<vmem>>, %arg3: memref<1x8x128xf32, #tpu.memory_space<vmem>>) attributes {dimension_semantics = [#tpu.dimension_semantics<parallel>], iteration_bounds = array<i64: 1>, scalar_prefetch = 0 : i64, scratch_operands = 0 : i64, tpu.core_type = #tpu.core_type<tc>, window_params = [{transform_indices = @transform_0, window_bounds = array<i64: 3, 1, 8, 128>}, {transform_indices = @transform_1, window_bounds = array<i64: 1, 8, 128>}, {transform_indices = @transform_2, window_bounds = array<i64: 1, 8, 128>}]} {
    %cst = arith.constant 0.000000e+00 : f32
    %0 = vector.broadcast %cst : f32 to vector<8x128xf32>
    %cst_0 = arith.constant 8.000000e-01 : f32
    %1 = vector.broadcast %cst_0 : f32 to vector<8x128xf32>
    %cst_1 = arith.constant 4.000000e-01 : f32
    %2 = vector.broadcast %cst_1 : f32 to vector<8x128xf32>
    %cst_2 = arith.constant 8.000000e-01 : f32
    %3 = vector.broadcast %cst_2 : f32 to vector<8x128xf32>
    %c0 = arith.constant 0 : index
    %c0_3 = arith.constant 0 : index
    %c0_4 = arith.constant 0 : index
    %4 = vector.load %arg2[%c0, %c0_3, %c0_4] : memref<1x8x128xi8, #tpu.memory_space<vmem>>, vector<1x8x128xi8>
    %5 = vector.shape_cast %4 : vector<1x8x128xi8> to vector<8x128xi8>
    %6 = arith.extsi %5 : vector<8x128xi8> to vector<8x128xi32>
    %c0_5 = arith.constant 0 : index
    %c0_6 = arith.constant 0 : index
    %c0_7 = arith.constant 0 : index
    %c0_8 = arith.constant 0 : index
    %7 = vector.load %arg1[%c0_5, %c0_6, %c0_7, %c0_8] : memref<3x1x8x128xf32, #tpu.memory_space<vmem>>, vector<1x1x8x128xf32>
    %8 = vector.shape_cast %7 : vector<1x1x8x128xf32> to vector<8x128xf32>
    %c1 = arith.constant 1 : index
    %c0_9 = arith.constant 0 : index
    %c0_10 = arith.constant 0 : index
    %c0_11 = arith.constant 0 : index
    %9 = vector.load %arg1[%c1, %c0_9, %c0_10, %c0_11] : memref<3x1x8x128xf32, #tpu.memory_space<vmem>>, vector<1x1x8x128xf32>
    %10 = vector.shape_cast %9 : vector<1x1x8x128xf32> to vector<8x128xf32>
    %c2 = arith.constant 2 : index
    %c0_12 = arith.constant 0 : index
    %c0_13 = arith.constant 0 : index
    %c0_14 = arith.constant 0 : index
    %11 = vector.load %arg1[%c2, %c0_12, %c0_13, %c0_14] : memref<3x1x8x128xf32, #tpu.memory_space<vmem>>, vector<1x1x8x128xf32>
    %12 = vector.shape_cast %11 : vector<1x1x8x128xf32> to vector<8x128xf32>
    %13 = arith.maximumf %8, %10 : vector<8x128xf32>
    %14 = arith.maximumf %13, %12 : vector<8x128xf32>
    %15 = arith.subf %8, %14 : vector<8x128xf32>
    %16 = math.exp %15 : vector<8x128xf32>
    %c0_i32 = arith.constant 0 : i32
    %17 = vector.broadcast %c0_i32 : i32 to vector<8x128xi32>
    %18 = arith.cmpi eq, %6, %17 : vector<8x128xi32>
    %19 = arith.select %18, %15, %0 : vector<8x128xi1>, vector<8x128xf32>
    %20 = arith.select %18, %1, %0 : vector<8x128xi1>, vector<8x128xf32>
    %21 = arith.subf %10, %14 : vector<8x128xf32>
    %22 = math.exp %21 : vector<8x128xf32>
    %23 = arith.addf %16, %22 : vector<8x128xf32>
    %c1_i32 = arith.constant 1 : i32
    %24 = vector.broadcast %c1_i32 : i32 to vector<8x128xi32>
    %25 = arith.cmpi eq, %6, %24 : vector<8x128xi32>
    %26 = arith.select %25, %21, %19 : vector<8x128xi1>, vector<8x128xf32>
    %27 = arith.select %25, %2, %20 : vector<8x128xi1>, vector<8x128xf32>
    %28 = arith.subf %12, %14 : vector<8x128xf32>
    %29 = math.exp %28 : vector<8x128xf32>
    %30 = arith.addf %23, %29 : vector<8x128xf32>
    %c2_i32 = arith.constant 2 : i32
    %31 = vector.broadcast %c2_i32 : i32 to vector<8x128xi32>
    %32 = arith.cmpi eq, %6, %31 : vector<8x128xi32>
    %33 = arith.select %32, %28, %26 : vector<8x128xi1>, vector<8x128xf32>
    %34 = arith.select %32, %3, %27 : vector<8x128xi1>, vector<8x128xf32>
    %35 = math.log %30 : vector<8x128xf32>
    %36 = arith.subf %33, %35 : vector<8x128xf32>
    %37 = math.exp %36 : vector<8x128xf32>
    %cst_15 = arith.constant 1.000000e+00 : f32
    %38 = vector.broadcast %cst_15 : f32 to vector<8x128xf32>
    %39 = arith.subf %38, %37 : vector<8x128xf32>
    %40 = arith.mulf %39, %39 : vector<8x128xf32>
    %41 = arith.mulf %34, %40 : vector<8x128xf32>
    %42 = arith.mulf %41, %36 : vector<8x128xf32>
    %43 = arith.addf %0, %42 : vector<8x128xf32>
    %cst_16 = arith.constant 0.000000e+00 : f32
    %44 = vector.broadcast %cst_16 : f32 to vector<8x128xf32>
    %45 = arith.subf %44, %43 : vector<8x128xf32>
    %c0_17 = arith.constant 0 : index
    %c0_18 = arith.constant 0 : index
    %c0_19 = arith.constant 0 : index
    %46 = vector.load %arg3[%c0_17, %c0_18, %c0_19] : memref<1x8x128xf32, #tpu.memory_space<vmem>>, vector<1x8x128xf32>
    %47 = vector.shape_cast %46 : vector<1x8x128xf32> to vector<8x128xf32>
    %48 = vector.shape_cast %45 : vector<8x128xf32> to vector<1x8x128xf32>
    tpu.vector_store %arg3[%c0_17, %c0_18, %c0_19], %48 {strides = array<i32>} : memref<1x8x128xf32, #tpu.memory_space<vmem>>, vector<1x8x128xf32>,
    return
  }
  func.func @transform_0(%arg0: i32) -> (i32, i32, i32, i32) {
    %c0_i32 = arith.constant 0 : i32
    %c0_i32_0 = arith.constant 0 : i32
    %c0_i32_1 = arith.constant 0 : i32
    %c0_i32_2 = arith.constant 0 : i32
    return %c0_i32, %arg0, %c0_i32_0, %c0_i32_1 : i32, i32, i32, i32
  }
  func.func @transform_1(%arg0: i32) -> (i32, i32, i32) {
    %c0_i32 = arith.constant 0 : i32
    %c0_i32_0 = arith.constant 0 : i32
    %c0_i32_1 = arith.constant 0 : i32
    return %arg0, %c0_i32, %c0_i32_0 : i32, i32, i32
  }
  func.func @transform_2(%arg0: i32) -> (i32, i32, i32) {
    %c0_i32 = arith.constant 0 : i32
    %c0_i32_0 = arith.constant 0 : i32
    %c0_i32_1 = arith.constant 0 : i32
    return %arg0, %c0_i32, %c0_i32_0 : i32, i32, i32
  }
}

</mosaic_0001>

<bundles_post_ra>
// kernel: tpu_custom_call.1
= control target key start
LH: loop header
LB: loop body
LE: loop exit
PB: predicated region body
PF: predicated region fallthrough
CT: control target
= control target key end

     0   :  { %7 = vsyncpa [#allocation3], 0  ;;  %s207_s0 = inlined_call_operand.hbm [shape: f32[3,1,8,128], index: 0, kind: input, shape index: {}]   ;;  %s208_s1 = inlined_call_operand.hbm [shape: s8[1,8,128], index: 1, kind: input, shape index: {}]   ;;  %s209_s2 = inlined_call_operand.hbm [shape: f32[1,8,128], index: 2, kind: output, shape index: {}]  }
   0x1   :  { %8 = vsyncpa [#allocation6], 0 }
   0x2   :  { %9 = vsyncpa [#allocation4], 0  ;;  %s177_s9 = smov [#allocation2]  }
   0x3   :  { %s15_s10 = sshll.u32 %s177_s9, 4  ;;  %s16_s10 = int_to_ptr.vmem [resolvable:$true] %s15_s10 }
   0x4   :  { %s119_s11 = scalar_lea.vmem %s16_s10, 384  ;;  %p124_p1 = scmp.lt.s32.totalorder %s16_s10, %s16_s10 }
   0x5   :  { %p120_p0 = scmp.ne.s32.totalorder %s16_s10, %s119_s11  ;;  %p125_p2 = scmp.lt.s32.totalorder %s119_s11, %s119_s11 }
   0x7   :  { %p126_p3 = por %p125_p2, %p124_p1 }
   0x9   :  { %p127_p4 = pnand %p126_p3, %p120_p0 }
   0xb   :  { %130 = shalt.err (!%p127_p4)
}
   0xc   :  { %s178_s12 = smov 128   ;;  %s179_s13 = smov 8  }
   0xd   :  { %21 = dma.hbm_to_vmem [thread:$0]  %s207_s0, 384, %s16_s10, [#allocation3], %s178_s12, %s178_s12, %s179_s13  }
   0xe   :  { %s180_s16 = smov [#allocation5]  }
   0xf   :  { %s28_s17 = sshll.u32 %s180_s16, 4  ;;  %s29_s17 = int_to_ptr.vmem [resolvable:$true] %s28_s17 }
  0x10   :  { %s139_s18 = scalar_lea.vmem %s29_s17, 32  ;;  %p144_p6 = scmp.lt.s32.totalorder %s29_s17, %s29_s17 }
  0x11   :  { %p140_p5 = scmp.ne.s32.totalorder %s29_s17, %s139_s18  ;;  %p145_p7 = scmp.lt.s32.totalorder %s139_s18, %s139_s18 }
  0x13   :  { %p146_p8 = por %p145_p7, %p144_p6 }
  0x15   :  { %p147_p9 = pnand %p146_p8, %p140_p5 }
  0x17   :  { %150 = shalt.err (!%p147_p9)
}
  0x18   :  { %31 = dma.hbm_to_vmem [thread:$0]  %s208_s1, 32, %s29_s17, [#allocation6]  }
  0x19   :  { %171 = dma.done.wait [#allocation3], 384  }
  0x1a   :  { %172 = vsyncadd [#allocation3], 4294966912 }
  0x1b   :  { %173 = dma.done.wait [#allocation6], 32  }
  0x1c   :  { %174 = vsyncadd [#allocation6], 4294967264  ;;  %v40_v0 = vld [vmem:[#allocation2] sm:$0xff]  ;;  %v42_v1 = vld [vmem:[#allocation2 + $0x8] sm:$0xff]  ;;  %v181_v25 = vmov 0.0   ;;  %s182_s0 = smov [#allocation7]  }
  0x1d   :  { %v44_v2 = vld [vmem:[#allocation2 + $0x10] sm:$0xff]  ;;  %v45_v3 = vmax.f32 %v40_v0, %v42_v1  ;;  %v38_v15 = vld [vmem:[#allocation5] sm:$0x3]  ;;  %s85_s1 = sshll.u32 %s182_s0, 4  ;;  %s86_s1 = int_to_ptr.vmem [resolvable:$true] %s85_s1 }
  0x1e   :  { %v39_v17 = vunpack.c.0.s8 %v38_v15  ;;  %s151_s21 = scalar_lea.vmem %s86_s1, 128  ;;  %p156_p11 = scmp.lt.s32.totalorder %s86_s1, %s86_s1 }
  0x1f   :  { %v46_v4 = vmax.f32 %v45_v3, %v44_v2  ;;  %p152_p10 = scmp.ne.s32.totalorder %s86_s1, %s151_s21  ;;  %p157_p12 = scmp.lt.s32.totalorder %s151_s21, %s151_s21 }
  0x20   :  { %vm50_vm0 = vcmp.eq.s32.totalorder %v39_v17, 0  ;;  %vm57_vm1 = vcmp.eq.s32.totalorder %v39_v17, 1  ;;  %vm64_vm2 = vcmp.eq.s32.totalorder %v39_v17, 2 }
  0x21   :  { %v47_v5 = vsub.f32 %v40_v0, %v46_v4  ;;  %v53_v6 = vsub.f32 %v42_v1, %v46_v4  ;;  %v60_v7 = vsub.f32 %v44_v2, %v46_v4  ;;  %v52_v26 = vsel %vm50_vm0, 0.8, %v181_v25  ;;  %p158_p13 = por %p157_p12, %p156_p11 }
  0x22   :  { %v59_v27 = vsel %vm57_vm1, 0.4, %v52_v26 }
  0x23   :  { %v48_v8 = vmul.f32 1.442695, %v47_v5  ;;  %v54_v9 = vmul.f32 1.442695, %v53_v6  ;;  %v61_v10 = vmul.f32 1.442695, %v60_v7  ;;  %p159_p0 = pnand %p158_p13, %p152_p10 }
  0x24   :  { %v51_v18 = vsel %vm50_vm0, %v47_v5, 0.0  ;;  %v66_v30 = vsel %vm64_vm2, 0.8, %v59_v27 }
  0x25   :  { %101 = vpow2.f32 %v48_v8  ;;  %v58_v19 = vsel %vm57_vm1, %v53_v6, %v51_v18 }
  0x26   :  { %103 = vpow2.f32 %v54_v9  ;;  %v65_v21 = vsel %vm64_vm2, %v60_v7, %v58_v19 }
  0x27   :  { %105 = vpow2.f32 %v61_v10 }
  0x32   :  { %v102_v11 = vpop.eup %101 }
  0x33   :  { %v104_v12 = vpop.eup %103 }
  0x34   :  { %v106_v13 = vpop.eup %105  ;;  %v56_v14 = vadd.f32 %v104_v12, %v102_v11 }
  0x36   :  { %v63_v16 = vadd.f32 %v106_v13, %v56_v14 }
  0x38   :  { %107 = vlog2.f32 %v63_v16 }
  0x45   :  { %v108_v20 = vpop.eup %107 }
  0x46   :  { %v68_v22 = vmul.f32 0.6931472, %v108_v20 }
  0x48   :  { %v69_v23 = vsub.f32 %v65_v21, %v68_v22 }
  0x4a   :  { %v70_v24 = vmul.f32 1.442695, %v69_v23 }
  0x4c   :  { %109 = vpow2.f32 %v70_v24 }
  0x59   :  { %v110_v28 = vpop.eup %109 }
  0x5a   :  { %v72_v29 = vsub.f32 1.0, %v110_v28 }
  0x5c   :  { %v73_v31 = vmul.f32 %v72_v29, %v72_v29 }
  0x5e   :  { %v74_v32 = vmul.f32 %v73_v31, %v66_v30 }
  0x60   :  { %v75_v33 = vmul.f32 %v74_v32, %v69_v23 }
  0x62   :  { %v77_v34 = vsub.f32 0.0, %v75_v33 }
  0x64   :  { %78 = vst [vmem:[#allocation7] sm:$0xff] %v77_v34 }
  0x65   :  { %162 = shalt.err (!%p159_p0)
}
  0x66   :  { %88 = dma.vmem_to_hbm [thread:$0]  %s86_s1, 128, %s209_s2, [#allocation4]  }
  0x67   :  { %175 = dma.done.wait [#allocation4], 128  }
  0x68   :  { %176 = vsyncadd [#allocation4], 4294967168 }
  0x69   :  { %92 = vsyncpa [#allocation3], 1 }
  0x6a   :  { %93 = vsyncpa [#allocation6], 1 }
  0x6b   :  { %94 = vsyncpa [#allocation4], 1 }

</bundles_post_ra>
